<compile_context>
chip_gen: v7x
topology: tpu7x:2x2x1
jax: 0.10.0
libtpu: 0.0.40
codegen_flags: <defaults>
</compile_context>

<pallas_src>
import jax
import jax.numpy as jnp
from jax.experimental import pallas as pl
from jax.experimental.pallas import tpu as pltpu


def _round_up(x, m):
    return ((x + m - 1) // m) * m


def weighted_pixelwise_mse(
    recon,
    target,
    background_val=87,          # parity with the PyTorch module; unused in forward
    foreground_thresh=110,
    foreground_weight=5.0,
    background_weight=1.0,
    lane_width=512,             # lane-dense slab width (multiple of 128)
    row_tile=512,               # rows per block -> (512, 512) f32 = 1 MiB per input block
):
    """recon, target: (B, 1, H, W) arrays (any float dtype). Returns scalar f32 mean loss."""
    assert recon.shape == target.shape
    total = 1
    for d in recon.shape:
        total *= int(d)

    L = int(lane_width)
    assert L % 128 == 0

    rows = -(-total // L)                       # ceil
    tm = min(int(row_tile), _round_up(rows, 8))  # always a multiple of 8
    n_tiles = -(-rows // tm)
    n_outer = 2 if n_tiles >= 2 else 1          # megacore split (v7x); no-op elsewhere
    n_tiles = _round_up(n_tiles, n_outer)
    n_inner = n_tiles // n_outer
    rows_padded = n_tiles * tm
    pad = rows_padded * L - total

    # Identical zero padding in both inputs -> padded diff == 0 -> contributes nothing.
    x = jnp.pad(recon.reshape(-1), (0, pad)).reshape(rows_padded, L)
    y = jnp.pad(target.reshape(-1), (0, pad)).reshape(rows_padded, L)

    # Compile-time constants (plain Python floats -> no captured tracers).
    fg_t = float(foreground_thresh)
    fg_w = float(foreground_weight)
    bg_w = float(background_weight)

    def kernel(r_ref, t_ref, o_ref, acc_ref):
        i = pl.program_id(1)

        @pl.when(i == 0)
        def _():
            acc_ref[...] = jnp.zeros_like(acc_ref)

        r = r_ref[...].astype(jnp.float32)
        t = t_ref[...].astype(jnp.float32)
        diff = r - t
        w = jnp.where(t > fg_t, fg_w, bg_w)          # single vsel per vreg
        wsq = w * diff * diff                        # (tm, L) f32
        # Fold groups of 8 rows into the (8, L) accumulator: layout-preserving reshape,
        # pure elementwise VPU adds (no per-step cross-lane reduce).
        acc_ref[...] += wsq.reshape(tm // 8, 8, L).sum(axis=0)

        @pl.when(i == pl.num_programs(1) - 1)
        def _():
            o_ref[...] = acc_ref[...]

    partials = pl.pallas_call(
        kernel,
        out_shape=jax.ShapeDtypeStruct((n_outer * 8, L), jnp.float32),
        grid_spec=pltpu.PrefetchScalarGridSpec(
            num_scalar_prefetch=0,
            grid=(n_outer, n_inner),
            in_specs=[
                pl.BlockSpec((tm, L), lambda o, i: (o * n_inner + i, 0)),
                pl.BlockSpec((tm, L), lambda o, i: (o * n_inner + i, 0)),
            ],
            out_specs=pl.BlockSpec((8, L), lambda o, i: (o, 0)),
            scratch_shapes=[pltpu.VMEM((8, L), jnp.float32)],
        ),
        compiler_params=pltpu.CompilerParams(
            dimension_semantics=("parallel", "arbitrary"),
        ),
    )(x, y)

    # Single cheap cross-lane reduce + divide by the TRUE element count in the wrapper.
    return jnp.sum(partials) / jnp.float32(total)


def weighted_pixelwise_mse_ref(recon, target,
                               foreground_thresh=110,
                               foreground_weight=5.0,
                               background_weight=1.0):
    pixel_loss = (recon - target) ** 2
    fg = (target > foreground_thresh).astype(jnp.float32)
    w = fg * foreground_weight + (1.0 - fg) * background_weight
    return jnp.mean(w * pixel_loss)


if __name__ == "__main__":
    key = jax.random.PRNGKey(0)

    # Shapes consistent with the module's (B, 1, H, W) grayscale frames. The larger one
    # exercises padding, multi-tile grids and the 2-way parallel outer axis.
    shapes = [(2, 1, 16, 16), (4, 1, 84, 84), (8, 1, 210, 160)]

    for shape in shapes:
        key, k1, k2 = jax.random.split(key, 3)
        # target: pixel values in [0, 255) -> plenty of background and some foreground (>110)
        target = jax.random.uniform(k1, shape, jnp.float32, 0.0, 255.0)
        # recon: noisy version of target
        recon = target + 10.0 * jax.random.normal(k2, shape, jnp.float32)

        loss = weighted_pixelwise_mse(recon, target)
        loss = jax.block_until_ready(loss)

        ref = weighted_pixelwise_mse_ref(recon, target)
        assert jnp.allclose(loss, ref, rtol=1e-4, atol=1e-5), (shape, loss, ref)

    print("KERNEL_OK")
</pallas_src>

<mosaic_0001>
module attributes {stable_mosaic.version = 11 : i64} {
  func.func @kernel(%arg0: i32, %arg1: i32, %arg2: memref<8x512xf32, #tpu.memory_space<vmem>>, %arg3: memref<8x512xf32, #tpu.memory_space<vmem>>, %arg4: memref<8x512xf32, #tpu.memory_space<vmem>>, %arg5: memref<8x512xf32, #tpu.memory_space<vmem>>) attributes {dimension_semantics = [#tpu.dimension_semantics<parallel>, #tpu.dimension_semantics<arbitrary>], iteration_bounds = array<i64: 1, 1>, scalar_prefetch = 0 : i64, scratch_operands = 1 : i64, tpu.core_type = #tpu.core_type<tc>, window_params = [{transform_indices = @transform_0, window_bounds = array<i64: 8, 512>}, {transform_indices = @transform_1, window_bounds = array<i64: 8, 512>}, {transform_indices = @transform_2, window_bounds = array<i64: 8, 512>}]} {
    %c0_i32 = arith.constant 0 : i32
    %0 = arith.cmpi eq, %arg1, %c0_i32 : i32
    %1 = arith.extui %0 : i1 to i32
    %c0_i32_0 = arith.constant 0 : i32
    %2 = arith.cmpi ne, %1, %c0_i32_0 : i32
    scf.if %2 {
      %cst_13 = arith.constant 0.000000e+00 : f32
      %21 = vector.broadcast %cst_13 : f32 to vector<8x512xf32>
      %c0_14 = arith.constant 0 : index
      %c0_15 = arith.constant 0 : index
      %22 = vector.load %arg5[%c0_14, %c0_15] : memref<8x512xf32, #tpu.memory_space<vmem>>, vector<8x512xf32>
      tpu.vector_store %arg5[%c0_14, %c0_15], %21 {strides = array<i32>} : memref<8x512xf32, #tpu.memory_space<vmem>>, vector<8x512xf32>,
    } else {
    }
    %c0 = arith.constant 0 : index
    %c0_1 = arith.constant 0 : index
    %3 = vector.load %arg2[%c0, %c0_1] : memref<8x512xf32, #tpu.memory_space<vmem>>, vector<8x512xf32>
    %c0_2 = arith.constant 0 : index
    %c0_3 = arith.constant 0 : index
    %4 = vector.load %arg3[%c0_2, %c0_3] : memref<8x512xf32, #tpu.memory_space<vmem>>, vector<8x512xf32>
    %5 = arith.subf %3, %4 : vector<8x512xf32>
    %cst = arith.constant 1.100000e+02 : f32
    %6 = vector.broadcast %cst : f32 to vector<8x512xf32>
    %7 = arith.cmpf ogt, %4, %6 : vector<8x512xf32>
    %cst_4 = arith.constant 5.000000e+00 : f32
    %cst_5 = arith.constant 1.000000e+00 : f32
    %8 = vector.broadcast %cst_4 : f32 to vector<8x512xf32>
    %9 = vector.broadcast %cst_5 : f32 to vector<8x512xf32>
    %10 = arith.select %7, %8, %9 : vector<8x512xi1>, vector<8x512xf32>
    %11 = arith.mulf %10, %5 : vector<8x512xf32>
    %12 = arith.mulf %11, %5 : vector<8x512xf32>
    %c0_6 = arith.constant 0 : index
    %c0_7 = arith.constant 0 : index
    %13 = vector.load %arg5[%c0_6, %c0_7] : memref<8x512xf32, #tpu.memory_space<vmem>>, vector<8x512xf32>
    %14 = vector.shape_cast %12 : vector<8x512xf32> to vector<1x8x512xf32>
    %cst_8 = arith.constant dense<0.000000e+00> : vector<8x512xf32>
    %15 = vector.multi_reduction <add>, %14, %cst_8 [0] : vector<1x8x512xf32> to vector<8x512xf32>
    %16 = arith.addf %13, %15 : vector<8x512xf32>
    %c0_9 = arith.constant 0 : index
    %c0_10 = arith.constant 0 : index
    %17 = vector.load %arg5[%c0_9, %c0_10] : memref<8x512xf32, #tpu.memory_space<vmem>>, vector<8x512xf32>
    tpu.vector_store %arg5[%c0_9, %c0_10], %16 {strides = array<i32>} : memref<8x512xf32, #tpu.memory_space<vmem>>, vector<8x512xf32>,
    %c0_i32_11 = arith.constant 0 : i32
    %18 = arith.cmpi eq, %arg1, %c0_i32_11 : i32
    %19 = arith.extui %18 : i1 to i32
    %c0_i32_12 = arith.constant 0 : i32
    %20 = arith.cmpi ne, %19, %c0_i32_12 : i32
    scf.if %20 {
      %c0_13 = arith.constant 0 : index
      %c0_14 = arith.constant 0 : index
      %21 = vector.load %arg5[%c0_13, %c0_14] : memref<8x512xf32, #tpu.memory_space<vmem>>, vector<8x512xf32>
      %c0_15 = arith.constant 0 : index
      %c0_16 = arith.constant 0 : index
      %22 = vector.load %arg4[%c0_15, %c0_16] : memref<8x512xf32, #tpu.memory_space<vmem>>, vector<8x512xf32>
      tpu.vector_store %arg4[%c0_15, %c0_16], %21 {strides = array<i32>} : memref<8x512xf32, #tpu.memory_space<vmem>>, vector<8x512xf32>,
    } else {
    }
    return
  }
  func.func @transform_0(%arg0: i32, %arg1: i32) -> (i32, i32) {
    %c1_i32 = arith.constant 1 : i32
    %0 = arith.muli %arg0, %c1_i32 : i32
    %1 = arith.addi %0, %arg1 : i32
    %c0_i32 = arith.constant 0 : i32
    %c0_i32_0 = arith.constant 0 : i32
    return %1, %c0_i32 : i32, i32
  }
  func.func @transform_1(%arg0: i32, %arg1: i32) -> (i32, i32) {
    %c1_i32 = arith.constant 1 : i32
    %0 = arith.muli %arg0, %c1_i32 : i32
    %1 = arith.addi %0, %arg1 : i32
    %c0_i32 = arith.constant 0 : i32
    %c0_i32_0 = arith.constant 0 : i32
    return %1, %c0_i32 : i32, i32
  }
  func.func @transform_2(%arg0: i32, %arg1: i32) -> (i32, i32) {
    %c0_i32 = arith.constant 0 : i32
    %c0_i32_0 = arith.constant 0 : i32
    return %arg0, %c0_i32 : i32, i32
  }
}

</mosaic_0001>

<bundles_post_ra>
// kernel: tpu_custom_call.1
= control target key start
LH: loop header
LB: loop body
LE: loop exit
PB: predicated region body
PF: predicated region fallthrough
CT: control target
= control target key end

     0   :  { %7 = vsyncpa [#allocation4], 0  ;;  %s256_s0 = inlined_call_operand.hbm [shape: f32[8,512], index: 0, kind: input, shape index: {}]   ;;  %s257_s1 = inlined_call_operand.hbm [shape: f32[8,512], index: 1, kind: input, shape index: {}]   ;;  %s258_s2 = inlined_call_operand.hbm [shape: f32[8,512], index: 2, kind: output, shape index: {}]  }
   0x1   :  { %8 = vsyncpa [#allocation7], 0 }
   0x2   :  { %9 = vsyncpa [#allocation5], 0  ;;  %s201_s9 = smov [#allocation3]   ;;  %s202_s11 = smov [#allocation6]  }
   0x3   :  { %s20_s10 = sshll.u32 %s201_s9, 4  ;;  %s34_s12 = sshll.u32 %s202_s11, 4  ;;  %s21_s10 = int_to_ptr.vmem [resolvable:$true] %s20_s10  ;;  %s35_s12 = int_to_ptr.vmem [resolvable:$true] %s34_s12 }
   0x4   :  { %s129_s15 = scalar_lea.hbm %s256_s0, 512 }
   0x5   :  { %p130_p0 = scmp.ne.s32.totalorder %s256_s0, %s129_s15  ;;  %p133_p1 = scmp.lt.u32.totalorder %s129_s15, %s256_s0 }
   0x7   :  { %p135_p2 = pnand %p133_p1, %p130_p0 }
   0x9   :  { %138 = shalt.err (!%p135_p2)
}
   0xa   :  { %s139_s20 = scalar_lea.vmem %s21_s10, 512  ;;  %p144_p4 = scmp.lt.s32.totalorder %s21_s10, %s21_s10 }
   0xb   :  { %p140_p3 = scmp.ne.s32.totalorder %s21_s10, %s139_s20  ;;  %p145_p5 = scmp.lt.s32.totalorder %s139_s20, %s139_s20 }
   0xd   :  { %p146_p6 = por %p145_p5, %p144_p4 }
   0xf   :  { %p147_p7 = pnand %p146_p6, %p140_p3 }
  0x11   :  { %150 = shalt.err (!%p147_p7)
}
  0x12   :  { %23 = dma.hbm_to_vmem [thread:$0]  %s256_s0, 512, %s21_s10, [#allocation4]  }
  0x13   :  { %s151_s25 = scalar_lea.hbm %s257_s1, 512 }
  0x14   :  { %p152_p8 = scmp.ne.s32.totalorder %s257_s1, %s151_s25  ;;  %p155_p9 = scmp.lt.u32.totalorder %s151_s25, %s257_s1 }
  0x16   :  { %p157_p10 = pnand %p155_p9, %p152_p8 }
  0x18   :  { %160 = shalt.err (!%p157_p10)
}
  0x19   :  { %s161_s30 = scalar_lea.vmem %s35_s12, 512  ;;  %p166_p12 = scmp.lt.s32.totalorder %s35_s12, %s35_s12 }
  0x1a   :  { %p162_p11 = scmp.ne.s32.totalorder %s35_s12, %s161_s30  ;;  %p167_p13 = scmp.lt.s32.totalorder %s161_s30, %s161_s30 }
  0x1c   :  { %p168_p0 = por %p167_p13, %p166_p12 }
  0x1e   :  { %p169_p1 = pnand %p168_p0, %p162_p11 }
  0x20   :  { %172 = shalt.err (!%p169_p1)
}
  0x21   :  { %37 = dma.hbm_to_vmem [thread:$0]  %s257_s1, 512, %s35_s12, [#allocation7]  }
  0x22   :  { %195 = dma.done.wait [#allocation4], 512  }
  0x23   :  { %196 = vsyncadd [#allocation4], 4294966784 }
  0x24   :  { %197 = dma.done.wait [#allocation7], 512  }
  0x25   :  { %198 = vsyncadd [#allocation7], 4294966784  ;;  %v54_v0 = vld [vmem:[#allocation3] sm:$0xff]  ;;  %v55_v2 = vld [vmem:[#allocation3 + $0x8] sm:$0xff]  ;;  %v203_v7 = vmov 1.0   ;;  %s204_s1 = smov [#allocation8]  }
  0x26   :  { %v58_v1 = vld [vmem:[#allocation6] sm:$0xff]  ;;  %v59_v4 = vld [vmem:[#allocation6 + $0x8] sm:$0xff]  ;;  %v56_v5 = vld [vmem:[#allocation3 + $0x10] sm:$0xff]  ;;  %s115_s4 = sshll.u32 %s204_s1, 4  ;;  %s116_s4 = int_to_ptr.vmem [resolvable:$true] %s115_s4 }
  0x27   :  { %v62_v3 = vsub.f32 %v54_v0, %v58_v1  ;;  %vm66_vm0 = vcmp.gt.f32.partialorder %v58_v1, 110.0  ;;  %v60_v6 = vld [vmem:[#allocation6 + $0x10] sm:$0xff]  ;;  %v63_v9 = vsub.f32 %v55_v2, %v59_v4  ;;  %vm67_vm1 = vcmp.gt.f32.partialorder %v59_v4, 110.0  ;;  %v57_v11 = vld [vmem:[#allocation3 + $0x18] sm:$0xff]  ;;  %s173_s5 = scalar_lea.vmem %s116_s4, 512  ;;  %p178_p3 = scmp.lt.s32.totalorder %s116_s4, %s116_s4 }
  0x28   :  { %v70_v8 = vsel %vm66_vm0, 5.0, %v203_v7  ;;  %v64_v10 = vsub.f32 %v56_v5, %v60_v6  ;;  %v61_v12 = vld [vmem:[#allocation6 + $0x18] sm:$0xff]  ;;  %v71_v14 = vsel %vm67_vm1, 5.0, %v203_v7  ;;  %vm68_vm2 = vcmp.gt.f32.partialorder %v60_v6, 110.0  ;;  %p174_p2 = scmp.ne.s32.totalorder %s116_s4, %s173_s5  ;;  %p179_p4 = scmp.lt.s32.totalorder %s173_s5, %s173_s5 }
  0x29   :  { %v74_v13 = vmul.f32 %v70_v8, %v62_v3  ;;  %v65_v15 = vsub.f32 %v57_v11, %v61_v12  ;;  %v75_v16 = vmul.f32 %v71_v14, %v63_v9  ;;  %v72_v17 = vsel %vm68_vm2, 5.0, %v203_v7 }
  0x2a   :  { %vm69_vm3 = vcmp.gt.f32.partialorder %v61_v12, 110.0  ;;  %v76_v19 = vmul.f32 %v72_v17, %v64_v10  ;;  %p180_p5 = por %p179_p4, %p178_p3 }
  0x2b   :  { %v78_v18 = vmul.f32 %v74_v13, %v62_v3  ;;  %v73_v20 = vsel %vm69_vm3, 5.0, %v203_v7  ;;  %v79_v21 = vmul.f32 %v75_v16, %v63_v9 }
  0x2c   :  { %v77_v22 = vmul.f32 %v73_v20, %v65_v15  ;;  %v80_v23 = vmul.f32 %v76_v19, %v64_v10  ;;  %p181_p6 = pnand %p180_p5, %p174_p2 }
  0x2d   :  { %105 = vst [vmem:[#allocation8] sm:$0xff] %v78_v18  ;;  %106 = vst [vmem:[#allocation8 + $0x8] sm:$0xff] %v79_v21 }
  0x2e   :  { %v81_v24 = vmul.f32 %v77_v22, %v65_v15  ;;  %107 = vst [vmem:[#allocation8 + $0x10] sm:$0xff] %v80_v23 }
  0x30   :  { %108 = vst [vmem:[#allocation8 + $0x18] sm:$0xff] %v81_v24 }
  0x31   :  { %184 = shalt.err (!%p181_p6)
}
  0x32   :  { %s185_s8 = scalar_lea.hbm %s258_s2, 512 }
  0x33   :  { %p186_p7 = scmp.ne.s32.totalorder %s258_s2, %s185_s8  ;;  %p189_p8 = scmp.lt.u32.totalorder %s185_s8, %s258_s2 }
  0x35   :  { %p191_p9 = pnand %p189_p8, %p186_p7 }
  0x37   :  { %194 = shalt.err (!%p191_p9)
}
  0x38   :  { %118 = dma.vmem_to_hbm [thread:$0]  %s116_s4, 512, %s258_s2, [#allocation5]  }
  0x39   :  { %199 = dma.done.wait [#allocation5], 512  }
  0x3a   :  { %200 = vsyncadd [#allocation5], 4294966784 }
  0x3b   :  { %122 = vsyncpa [#allocation4], 1 }
  0x3c   :  { %123 = vsyncpa [#allocation7], 1 }
  0x3d   :  { %124 = vsyncpa [#allocation5], 1 }

</bundles_post_ra>
